<compile_context>
chip_gen: v7x
topology: tpu7x:2x2x1
jax: 0.10.0
libtpu: 0.0.40
codegen_flags: <defaults>
</compile_context>

<pallas_src>
import jax
import jax.numpy as jnp
from jax.experimental import pallas as pl
from jax.experimental.pallas import tpu as pltpu

SAFE_LOG_EPS = 1e-7                       # safe_log(x) = log(x + 1e-7)
_VMEM_BUFFER_BUDGET = 32 * 1024 * 1024    # double-buffered z + out blocks
_VMEM_LIMIT_BYTES = 48 * 1024 * 1024      # scoped VMEM limit (v7x-safe)


def _round_up(x, m):
    return ((x + m - 1) // m) * m


def _planar_logdet_kernel(params_ref, wseg_ref, z_ref, o_ref):
    # params_ref (SMEM, shape (2,)): [bias, ws] with ws = sum(weight * scale).
    b = params_ref[0]
    ws = params_ref[1]

    # Segment dot products via a tiny block-diagonal matmul (MXU, f32 acc):
    #   act[r, j] = <z_orig[r*k + j], weight> + bias
    act = jnp.dot(z_ref[...], wseg_ref[...],
                  preferred_element_type=jnp.float32) + b        # (tb, k)

    # Folded determinant: 1 + psi @ scale.T == 1 + (1 - tanh^2(act)) * sum(w*s)
    t = jnp.tanh(act)                                            # EUP
    det_grad = 1.0 + (1.0 - t * t) * ws
    o_ref[...] = jnp.log(jnp.abs(det_grad) + SAFE_LOG_EPS)


def _choose_pack_factor(B, D):
    """Pack k original rows into one lane-dense row (k*D <= 128), picking the
    largest k that divides B so the repack is a free contiguous reshape
    (no HBM padding copy)."""
    if D >= 128:
        return 1
    k = max(1, 128 // D)
    while k > 1 and B % k != 0:
        k -= 1
    return k


def _choose_batch_tile(n_rows, packed_d, in_itemsize, out_cols):
    """Largest batch tile (multiple of 8) whose double-buffered z + output
    VMEM footprint (with (8,128) lane padding) fits the budget, while keeping
    >= 2 grid blocks so the 'parallel' axis can shard across v7x's 2 TCs."""
    lanes_in = _round_up(packed_d, 128)
    lanes_out = _round_up(out_cols, 128)
    per_row = lanes_in * in_itemsize + lanes_out * 4             # f32 output
    tb = _VMEM_BUFFER_BUDGET // (2 * per_row)
    tb = max(8, (tb // 8) * 8)
    if n_rows >= 16:
        half = max(8, (((n_rows + 1) // 2) // 8) * 8)
        tb = min(tb, half)
    if tb >= n_rows:
        return n_rows
    return tb


def planar_flow_log_det_jacobian(z, weight, bias, scale):
    """z: (B, D); weight, scale: (1, D); bias: (1,)  ->  (B, 1) float32."""
    B, D = z.shape

    w32 = weight.astype(jnp.float32).reshape(D)
    s32 = scale.astype(jnp.float32).reshape(D)
    # Fold the second matmul away: psi @ scale.T == (1 - tanh^2) * sum(w*s).
    ws = jnp.sum(w32 * s32).reshape(1)
    params = jnp.concatenate(
        [bias.reshape(-1).astype(jnp.float32), ws])              # (2,) -> SMEM

    # Lane repacking for small D: (B, D) -> (B/k, k*D), free contiguous reshape.
    k = _choose_pack_factor(B, D)
    Bp, Dp = B // k, k * D
    zp = z.reshape(Bp, Dp)

    # Block-diagonal weights (k*D, k): column j holds `weight` in rows j*D:(j+1)*D.
    wseg = jnp.kron(jnp.eye(k, dtype=jnp.float32), w32.reshape(D, 1))   # (Dp, k)
    if z.dtype == jnp.bfloat16:
        wseg = wseg.astype(jnp.bfloat16)   # bf16 MXU operands, f32 accumulation

    itemsize = jnp.dtype(z.dtype).itemsize
    tb = _choose_batch_tile(Bp, Dp, itemsize, k)
    grid = (pl.cdiv(Bp, tb),)

    cost = pl.CostEstimate(
        flops=2 * B * D + 6 * B,
        transcendentals=2 * B,
        bytes_accessed=B * D * itemsize + B * 4 + 2 * D * 4 + 8,
    )

    out = pl.pallas_call(
        _planar_logdet_kernel,
        out_shape=jax.ShapeDtypeStruct((Bp, k), jnp.float32),
        grid=grid,
        in_specs=[
            # [bias, ws] scalars live on the scalar path (SMEM).
            pl.BlockSpec(memory_space=pltpu.MemorySpace.SMEM),
            # block-diagonal weight stays VMEM-resident across grid steps.
            pl.BlockSpec((Dp, k), lambda i: (0, 0)),
            # z streamed in large lane-dense batch tiles; Pallas double-buffers.
            pl.BlockSpec((tb, Dp), lambda i: (i, 0)),
        ],
        out_specs=pl.BlockSpec((tb, k), lambda i: (i, 0)),
        compiler_params=pltpu.CompilerParams(
            dimension_semantics=("parallel",),
            vmem_limit_bytes=_VMEM_LIMIT_BYTES,
        ),
        cost_estimate=cost,
    )(params, wseg, zp)

    # (Bp, k) row-major flatten restores the original row order -> (B, 1).
    return out.reshape(B, 1)


def _reference(z, weight, bias, scale):
    # Un-folded original formulation (two matmuls) for validation.
    act = z @ weight.T + bias.reshape(1, 1)
    psi = (1.0 - jnp.tanh(act) ** 2) * weight
    det_grad = 1.0 + psi @ scale.T
    return jnp.log(jnp.abs(det_grad) + SAFE_LOG_EPS)


if __name__ == "__main__":
    key = jax.random.PRNGKey(0)
    k_z, k_w, k_b, k_s = jax.random.split(key, 4)

    B, D = 64, 32  # small shapes: batch=64, feature dim=32 (packs to 128 lanes)

    z = jax.random.normal(k_z, (B, D), dtype=jnp.float32)
    weight = 0.1 * jax.random.normal(k_w, (1, D), dtype=jnp.float32)
    bias = 0.1 * jax.random.normal(k_b, (1,), dtype=jnp.float32)
    scale = 0.1 * jax.random.normal(k_s, (1, D), dtype=jnp.float32)

    out = jax.block_until_ready(planar_flow_log_det_jacobian(z, weight, bias, scale))
    ref = _reference(z, weight, bias, scale)
    assert out.shape == (B, 1)
    assert jnp.allclose(out, ref, atol=1e-5, rtol=1e-5), (out, ref)

    # Exercise the no-clean-pack fallback path (B not a multiple of 128//D).
    B2 = 10
    z2 = jax.random.normal(k_z, (B2, D), dtype=jnp.float32)
    out2 = jax.block_until_ready(planar_flow_log_det_jacobian(z2, weight, bias, scale))
    ref2 = _reference(z2, weight, bias, scale)
    assert out2.shape == (B2, 1)
    assert jnp.allclose(out2, ref2, atol=1e-5, rtol=1e-5), (out2, ref2)

    print("KERNEL_OK")
</pallas_src>

<mosaic_0001>
module attributes {stable_mosaic.version = 11 : i64} {
  func.func @_planar_logdet_kernel(%arg0: i32, %arg1: memref<2xf32, #tpu.memory_space<smem>>, %arg2: memref<128x4xf32, #tpu.memory_space<vmem>>, %arg3: memref<8x128xf32, #tpu.memory_space<vmem>>, %arg4: memref<8x4xf32, #tpu.memory_space<vmem>>) attributes {dimension_semantics = [#tpu.dimension_semantics<parallel>], iteration_bounds = array<i64: 2>, scalar_prefetch = 0 : i64, scratch_operands = 0 : i64, tpu.core_type = #tpu.core_type<tc>, window_params = [{transform_indices = @transform_0, window_bounds = array<i64: 2>}, {pipeline_mode = #tpu.pipeline_mode<synchronous>, transform_indices = @transform_1, window_bounds = array<i64: 128, 4>}, {transform_indices = @transform_2, window_bounds = array<i64: 8, 128>}, {transform_indices = @transform_3, window_bounds = array<i64: 8, 4>}]} {
    %c0 = arith.constant 0 : index
    %0 = memref.load %arg1[%c0] : memref<2xf32, #tpu.memory_space<smem>>
    %c1 = arith.constant 1 : index
    %1 = memref.load %arg1[%c1] : memref<2xf32, #tpu.memory_space<smem>>
    %c0_0 = arith.constant 0 : index
    %c0_1 = arith.constant 0 : index
    %2 = vector.load %arg3[%c0_0, %c0_1] : memref<8x128xf32, #tpu.memory_space<vmem>>, vector<8x128xf32>
    %c0_2 = arith.constant 0 : index
    %c0_3 = arith.constant 0 : index
    %3 = vector.load %arg2[%c0_2, %c0_3] : memref<128x4xf32, #tpu.memory_space<vmem>>, vector<128x4xf32>
    %cst = arith.constant dense<0.000000e+00> : vector<8x4xf32>
    %4 = tpu.matmul %2, %3, %cst {dimension_numbers = #tpu.dot_dimension_numbers<[1], [0], [0], [1], [0, 0, 1, 1], [], []>} : vector<8x128xf32>, vector<128x4xf32>, vector<8x4xf32> -> vector<8x4xf32>
    %5 = vector.broadcast %0 : f32 to vector<8x4xf32>
    %6 = arith.addf %4, %5 : vector<8x4xf32>
    %7 = math.tanh %6 : vector<8x4xf32>
    %8 = arith.mulf %7, %7 : vector<8x4xf32>
    %cst_4 = arith.constant 1.000000e+00 : f32
    %9 = vector.broadcast %cst_4 : f32 to vector<8x4xf32>
    %10 = arith.subf %9, %8 : vector<8x4xf32>
    %11 = vector.broadcast %1 : f32 to vector<8x4xf32>
    %12 = arith.mulf %10, %11 : vector<8x4xf32>
    %cst_5 = arith.constant 1.000000e+00 : f32
    %13 = vector.broadcast %cst_5 : f32 to vector<8x4xf32>
    %14 = arith.addf %13, %12 : vector<8x4xf32>
    %15 = math.absf %14 : vector<8x4xf32>
    %cst_6 = arith.constant 1.000000e-07 : f32
    %16 = vector.broadcast %cst_6 : f32 to vector<8x4xf32>
    %17 = arith.addf %15, %16 : vector<8x4xf32>
    %18 = math.log %17 : vector<8x4xf32>
    %c0_7 = arith.constant 0 : index
    %c0_8 = arith.constant 0 : index
    %19 = vector.load %arg4[%c0_7, %c0_8] : memref<8x4xf32, #tpu.memory_space<vmem>>, vector<8x4xf32>
    tpu.vector_store %arg4[%c0_7, %c0_8], %18 {strides = array<i32>} : memref<8x4xf32, #tpu.memory_space<vmem>>, vector<8x4xf32>,
    return
  }
  func.func @transform_0(%arg0: i32) -> i32 {
    %c0_i32 = arith.constant 0 : i32
    %c0_i32_0 = arith.constant 0 : i32
    return %c0_i32 : i32
  }
  func.func @transform_1(%arg0: i32) -> (i32, i32) {
    %c0_i32 = arith.constant 0 : i32
    %c0_i32_0 = arith.constant 0 : i32
    %c0_i32_1 = arith.constant 0 : i32
    return %c0_i32, %c0_i32_0 : i32, i32
  }
  func.func @transform_2(%arg0: i32) -> (i32, i32) {
    %c0_i32 = arith.constant 0 : i32
    %c0_i32_0 = arith.constant 0 : i32
    return %arg0, %c0_i32 : i32, i32
  }
  func.func @transform_3(%arg0: i32) -> (i32, i32) {
    %c0_i32 = arith.constant 0 : i32
    %c0_i32_0 = arith.constant 0 : i32
    return %arg0, %c0_i32 : i32, i32
  }
}

</mosaic_0001>

<bundles_post_ra>
// kernel: tpu_custom_call.1
= control target key start
LH: loop header
LB: loop body
LE: loop exit
PB: predicated region body
PF: predicated region fallthrough
CT: control target
= control target key end

     0   :  { %8 = vsyncpa [#allocation3], 0  ;;  %s512_s12 = smov 0   ;;  %s602_s0 = inlined_call_operand.vmem [shape: f32[2], index: 0, kind: input, shape index: {}]   ;;  %s603_s1 = inlined_call_operand.vmem [shape: f32[128,4], index: 1, kind: input, shape index: {}]   ;;  %s604_s2 = inlined_call_operand.vmem [shape: f32[16,128], index: 2, kind: input, shape index: {}]   ;;  %s605_s3 = inlined_call_operand.vmem [shape: f32[16,4], index: 3, kind: output, shape index: {}]  }
   0x1 LB: > { %s518_s13 = sadd.s32 4294967295, %s486_s12   ;;  %p349_p0 = scmp.ge.s32.totalorder %s486_s12, 1  ;;  %s486_s12 = sphi %s512_s12, %s14_s12  }
   0x2   : > { %p113_p1 = scmp.lt.s32.totalorder %s486_s12, 3  ;;  %s126_s16 = sshll.u32 %s602_s0, 4  ;;  %s127_s16 = int_to_ptr.vmem [resolvable:$true] %s126_s16 }
   0x3   : > { %p443_p3 = scmp.eq.s32.totalorder %s518_s13, 0  ;;  %s461_s18 = scalar_lea.vmem %s127_s16, 16 }
   0x4   : > { %p525_p2 = pnand %p349_p0, %p113_p1  ;;  %p462_p6 = scmp.ne.s32.totalorder %s127_s16, %s461_s18 }
   0x5   : > { %p469_p10 = scmp.lt.s32.totalorder %s127_s16, %s127_s16  ;;  %p470_p11 = scmp.lt.s32.totalorder %s461_s18, %s461_s18 }
   0x6   : > { %p439_p4 = pneg %p525_p2 }
   0x7   : > { %p471_p12 = por %p470_p11, %p469_p10 }
   0x8   : > { %p440_p5 = pnand %p443_p3, %p439_p4 }
   0xa   : > { %p463_p7 = pneg %p440_p5 }
   0xc   : > { %p464_p8 = pnand %p463_p7, %p462_p6 }
   0xe   : > { %p465_p9 = pneg %p464_p8 }
  0x10   : > { %p472_p13 = pnand %p471_p12, %p465_p9 }
  0x12   : > { %475 = shalt.err (!%p472_p13)
}
  0x13   : > { %s488_s19 = smov [#allocation2]   ;;  %149 = sbr.rel (%p525_p2) target bundleno = 314 (0x13a), region = 32 }
  0x14   : > { %442 = dma.vmem_to_smem (!%p440_p5), %s127_s16, 16, %s488_s19, [#allocation3]  }
  0x1a   : > { %481 = dma.done.wait (%p443_p3), [#allocation3], 16  }
  0x1b   : > { %483 = vsyncadd (%p443_p3), [#allocation3], 4294967280 }
  0x1c   : > { %155 = sfence }
  0x1d   : > { %v183_v0 = vld [vmem:[%s603_s1] sm:$0xff]  ;;  %v184_v1 = vld [vmem:[%s603_s1 + $0x8] sm:$0xff]  ;;  %v185_v2 = vld [vmem:[%s603_s1 + $0x10] sm:$0xff]  ;;  %v489_v3 = vmov 0.0|0.0   ;;  %vm490_vm0 = vmmov 0   ;;  %v491_v6 = vmov 0.0  }
  0x1e   : > { %411 = vmatprep.subr.bf16.mxu0 %v489_v3  ;;  %v412_v4 = vpack.c.bf16 %v184_v1, %v183_v0  ;;  %v186_v5 = vld [vmem:[%s603_s1 + $0x18] sm:$0xff]  ;;  %408 = vmatprep.mubr.msk.f32.mxu0 %vm490_vm0, %v491_v6  ;;  %v187_v8 = vld [vmem:[%s603_s1 + $0x20] sm:$0xff]  ;;  %v188_v9 = vld [vmem:[%s603_s1 + $0x28] sm:$0xff]  ;;  %p172_p0 = scmp.lt.s32.totalorder %s518_s13, 1  ;;  %s180_s4 = sld [smem:[#allocation2]]  ;;  %vm280_vm1 = vcmask 31744  }
  0x1f   : > { %v415_v7 = vpack.c.bf16 %v186_v5, %v185_v2  ;;  %v418_v10 = vpack.c.bf16 %v188_v9, %v187_v8  ;;  %v189_v11 = vld [vmem:[%s603_s1 + $0x30] sm:$0xff]  ;;  %v190_v12 = vld [vmem:[%s603_s1 + $0x38] sm:$0xff]  ;;  %v191_v14 = vld [vmem:[%s603_s1 + $0x40] sm:$0xff]  ;;  %s356_s5 = sld [smem:[#allocation2 + $0x1]] }
  0x20   : > { %413 = vmatpush3.bf16.msra.mxu0 %v412_v4  ;;  %v421_v13 = vpack.c.bf16 %v190_v12, %v189_v11  ;;  %v192_v15 = vld [vmem:[%s603_s1 + $0x48] sm:$0xff]  ;;  %v193_v17 = vld [vmem:[%s603_s1 + $0x50] sm:$0xff]  ;;  %v194_v18 = vld [vmem:[%s603_s1 + $0x58] sm:$0xff]  ;;  %s608_s13 = smov (!%p172_p0, %s518_s13), 1 }
  0x21   : > { %414 = vmatprep.subr.bf16.mxu0 %v489_v3  ;;  %v424_v16 = vpack.c.bf16 %v192_v15, %v191_v14  ;;  %v427_v19 = vpack.c.bf16 %v194_v18, %v193_v17  ;;  %v195_v20 = vld [vmem:[%s603_s1 + $0x60] sm:$0xff]  ;;  %v196_v21 = vld [vmem:[%s603_s1 + $0x68] sm:$0xff]  ;;  %v197_v23 = vld [vmem:[%s603_s1 + $0x70] sm:$0xff]  ;;  %s354_s27 = sshll.u32 %s608_s13, 3 }
  0x22   : > { %v430_v22 = vpack.c.bf16 %v196_v21, %v195_v20  ;;  %v198_v24 = vld [vmem:[%s603_s1 + $0x78] sm:$0xff]  ;;  %s175_s30 = scalar_lea.vmem %s604_s2, %s354_s27  ;;  %s179_s7 = scalar_lea.vmem %s605_s3, %s354_s27 }
  0x23   : > { %v433_v25 = vpack.c.bf16 %v198_v24, %v197_v23  ;;  %v182_v26 = vld [vmem:[%s175_s30] sm:$0xff] }
  0x24   : > { %416 = vmatpush3.bf16.msra.mxu0 %v415_v7  ;;  %v199_v27 = vstv %s180_s4 }
  0x25   : > { %417 = vmatprep.subr.bf16.mxu0 %v489_v3  ;;  %v273_v33 = vstv %s356_s5 }
  0x28   : > { %419 = vmatpush3.bf16.msra.mxu0 %v418_v10 }
  0x29   : > { %420 = vmatprep.subr.bf16.mxu0 %v489_v3 }
  0x2c   : > { %422 = vmatpush3.bf16.msra.mxu0 %v421_v13 }
  0x2d   : > { %423 = vmatprep.subr.bf16.mxu0 %v489_v3 }
  0x30   : > { %425 = vmatpush3.bf16.msra.mxu0 %v424_v16 }
  0x31   : > { %426 = vmatprep.subr.bf16.mxu0 %v489_v3 }
  0x34   : > { %428 = vmatpush3.bf16.msra.mxu0 %v427_v19 }
  0x35   : > { %429 = vmatprep.subr.bf16.mxu0 %v489_v3 }
  0x38   : > { %431 = vmatpush3.bf16.msra.mxu0 %v430_v22 }
  0x39   : > { %432 = vmatprep.subr.bf16.mxu0 %v489_v3 }
  0x3c   : > { %434 = vmatpush3.bf16.msra.mxu0 %v433_v25 }
  0x3f   : > { %409 = vmatmul.mubr.f32.vlgmr.msra.gmra.mrb[0].mxu0 %v182_v26 }
 0x112   : > { %v266_v28 = vpop.f32.mrb[0].mxu0 }
 0x113   : > { %v267_v29 = vadd.f32 %v266_v28, %v199_v27  ;;  %v410_v30 = vpop.f32.mrb[1].mxu0 }
 0x115   : > { %457 = vtanh.f32 %v267_v29 }
 0x11f   : > { %v458_v31 = vpop.eup %457 }
 0x120   : > { %v271_v32 = vmul.f32 %v458_v31, %v458_v31 }
 0x122   : > { %v272_v34 = vsub.f32 1.0, %v271_v32 }
 0x124   : > { %v274_v35 = vmul.f32 %v273_v33, %v272_v34 }
 0x126   : > { %v275_v36 = vadd.f32 1.0, %v274_v35 }
 0x128   : > { %v276_v37 = vand.u32 2147483647, %v275_v36 }
 0x12a   : > { %v277_v38 = vadd.f32 1e-07, %v276_v37 }
 0x12c   : > { %459 = vlog2.f32 %v277_v38 }
 0x136   : > { %v460_v39 = vpop.eup %459 }
 0x137   : > { %v279_v40 = vmul.f32 0.6931472, %v460_v39 }
 0x139   : > { %281 = vst.msk [vmem:[%s179_s7] sm:$0xff] %vm280_vm1, %v279_v40 }
 0x13a PF: > { %s14_s12 = sadd.s32 1, %s486_s12  }
 0x13b   : > { %p11_p1 = scmp.ge.s32.totalorder %s14_s12, 4  }
 0x13d   :  { %13 = sbr.rel (!%p11_p1) target bundleno = 1 (0x1), region = 67 }
 0x144   :  { %301 = vsyncpa [#allocation3], 1 }
 0x145   :  { %303 = vsyncpa [#allocation3 + $0x1], 1 }

</bundles_post_ra>
